<compile_context>
chip_gen: v6e
topology: v6e:2x2x1
jax: 0.10.0
libtpu: 0.0.40
codegen_flags: <defaults>
</compile_context>

<pallas_src>
import functools

import jax
import jax.numpy as jnp
from jax.experimental import pallas as pl
from jax.experimental.pallas import tpu as pltpu


def _round_up(v, m):
    return (v + m - 1) // m * m


def _conv_band_kernel(x_ref, w_ref, b_ref, o_ref, *, Kw, W_out):
    """One (batch, row-band) tile.

    x_ref : (Cin, R, Wband)           halo'd input band (compute dtype)
    w_ref : (Cout*TILE_H, Kw*Cin*R)   Toeplitz-expanded weights (compute dtype)
    b_ref : (Cout*TILE_H, 1)          bias, f32
    o_ref : (Cout, TILE_H, W_out)     output tile (lane dim = W_out)
    """
    x = x_ref[...]                                   # (Cin, R, Wband)
    Cin, R, _ = x.shape

    # rhs[(kw, ci, r), w] = x[ci, r, w + kw]: static lane slices + leading-dim
    # concat, then a free leading-dim merge (R % 8 == 0 keeps it tile-aligned).
    cols = jnp.concatenate([x[:, :, kw:kw + W_out] for kw in range(Kw)], axis=0)
    rhs = cols.reshape(Kw * Cin * R, W_out)

    acc = jnp.dot(w_ref[...], rhs, preferred_element_type=jnp.float32)
    acc = acc + b_ref[...]                           # broadcast (M, 1) over lanes

    Cout, TILE_H = o_ref.shape[0], o_ref.shape[1]
    o_ref[...] = acc.reshape(Cout, TILE_H, W_out).astype(o_ref.dtype)


def conv_layer_forward(x, weight, bias, stride, *, tile_h=8,
                       compute_dtype=jnp.bfloat16):
    """ReflectionPad2d(K//2) + Conv2d(Cin, Cout, K, stride), NCHW -> NCHW.

    x      : (N, Cin, H, W) float32
    weight : (Cout, Cin, K, K) float32 (PyTorch OIHW layout)
    bias   : (Cout,) float32
    """
    N, Cin, H, W = x.shape
    Cout, _, K, _ = weight.shape
    pad = K // 2
    out_dtype = x.dtype
    if tile_h % 8 != 0:
        raise ValueError("tile_h must be a multiple of 8")

    # ---- plain-JAX glue: reflection pad (+ space-to-depth for stride > 1) ----
    xp = jnp.pad(x, ((0, 0), (0, 0), (pad, pad), (pad, pad)), mode="reflect")
    Hp, Wp = H + 2 * pad, W + 2 * pad
    H_out = (Hp - K) // stride + 1
    W_out = (Wp - K) // stride + 1

    if stride == 1:
        x2, w2, Kq = xp, weight, K
        Hq, Wq, Cin2 = Hp, Wp, Cin
    else:
        # Fold the stride into channels so the kernel always runs stride-1.
        Kq = -(-K // stride)
        Kp = Kq * stride
        Hq, Wq = H_out + Kq - 1, W_out + Kq - 1
        Cin2 = Cin * stride * stride
        w_p = jnp.pad(weight, ((0, 0), (0, 0), (0, Kp - K), (0, Kp - K)))
        w2 = (w_p.reshape(Cout, Cin, Kq, stride, Kq, stride)
                 .transpose(0, 1, 3, 5, 2, 4)
                 .reshape(Cout, Cin2, Kq, Kq))
        xpp = jnp.pad(xp, ((0, 0), (0, 0),
                           (0, max(0, Hq * stride - Hp)),
                           (0, max(0, Wq * stride - Wp))))
        xpp = xpp[:, :, :Hq * stride, :Wq * stride]
        x2 = (xpp.reshape(N, Cin, Hq, stride, Wq, stride)
                 .transpose(0, 1, 3, 5, 2, 4)
                 .reshape(N, Cin2, Hq, Wq))

    # ---- row-band tiling (pad H_out up to a multiple of TILE_H, slice later) ----
    TH = tile_h
    T = -(-H_out // TH)
    H_out_p = T * TH
    R = _round_up(TH + Kq - 1, 8)            # halo'd band height (multiple of 8)
    CONTR = Kq * Cin2 * R
    M = Cout * TH

    # Pad rows so every R-row band is in bounds; extra rows only ever meet zero
    # entries of the Toeplitz weights or land in sliced-off padded output rows.
    Hneed = (T - 1) * TH + R
    x2 = jnp.pad(x2, ((0, 0), (0, 0), (0, Hneed - Hq), (0, 0)))

    # Halo'd row bands (N, T, Cin2, R, Wq): duplicating the halo keeps the standard
    # BlockSpec double-buffered pipeline (overlapping blocks aren't expressible).
    row_ix = (jnp.arange(T) * TH)[:, None] + jnp.arange(R)[None, :]
    bands = jnp.transpose(x2[:, :, row_ix, :], (0, 2, 1, 3, 4)).astype(compute_dtype)

    # Toeplitz-expanded, weight-stationary lhs:
    #   lhs[(co, h), (kw, ci, r)] = w2[co, ci, r - h, kw] if 0 <= r - h < Kq else 0
    h_idx = jnp.arange(TH)[:, None]
    r_idx = jnp.arange(R)[None, :]
    q = r_idx - h_idx
    valid = (q >= 0) & (q < Kq)
    qc = jnp.clip(q, 0, Kq - 1)
    wt = w2[:, :, qc, :]                                  # (Cout, Cin2, TH, R, Kq)
    wt = jnp.where(valid[None, None, :, :, None], wt, 0.0)
    lhs = (jnp.transpose(wt, (0, 2, 4, 1, 3))             # (Cout, TH, Kq, Cin2, R)
              .reshape(M, CONTR).astype(compute_dtype))
    bias2 = jnp.repeat(bias.astype(jnp.float32), TH).reshape(M, 1)

    # ---- pallas_call ----
    itemsize = jnp.dtype(compute_dtype).itemsize
    band_bytes = Cin2 * R * Wq * itemsize
    out_bytes = Cout * TH * W_out * 4
    vmem_limit = 2 * (band_bytes + out_bytes + M * CONTR * itemsize + M * 4)
    vmem_limit += Kq * Cin2 * R * W_out * itemsize + M * W_out * 4 + (4 << 20)
    vmem_limit = int(min(max(vmem_limit, 16 << 20), 52 << 20))  # safe on v5e/v6e/v7x

    cost = pl.CostEstimate(
        flops=2 * N * T * M * CONTR * W_out,
        transcendentals=0,
        bytes_accessed=int(bands.size) * itemsize + int(lhs.size) * itemsize
        + int(bias2.size) * 4 + N * Cout * H_out_p * W_out * 4,
    )

    kern = functools.partial(_conv_band_kernel, Kw=Kq, W_out=W_out)
    out = pl.pallas_call(
        kern,
        out_shape=jax.ShapeDtypeStruct((N, Cout, H_out_p, W_out), out_dtype),
        grid=(N, T),
        in_specs=[
            pl.BlockSpec((None, None, Cin2, R, Wq), lambda n, t: (n, t, 0, 0, 0)),
            pl.BlockSpec((M, CONTR), lambda n, t: (0, 0)),
            pl.BlockSpec((M, 1), lambda n, t: (0, 0)),
        ],
        out_specs=pl.BlockSpec((None, Cout, TH, W_out), lambda n, t: (n, 0, t, 0)),
        compiler_params=pltpu.CompilerParams(
            dimension_semantics=("parallel", "parallel"),
            vmem_limit_bytes=vmem_limit,
        ),
        cost_estimate=cost,
    )(bands, lhs, bias2)

    if H_out_p != H_out:
        out = out[:, :, :H_out, :]
    return out


def _reference(x, weight, bias, stride, dtype=jnp.float32):
    """Pure-JAX reference (lax conv); dtype controls operand precision."""
    K = weight.shape[-1]
    pad = K // 2
    xp = jnp.pad(x, ((0, 0), (0, 0), (pad, pad), (pad, pad)), mode="reflect")
    out = jax.lax.conv_general_dilated(
        xp.astype(dtype), weight.astype(dtype),
        window_strides=(stride, stride), padding="VALID",
        dimension_numbers=("NCHW", "OIHW", "NCHW"),
        preferred_element_type=jnp.float32)
    return out + bias.reshape(1, -1, 1, 1).astype(jnp.float32)


if __name__ == "__main__":
    # ConvLayer(in_channels=4, out_channels=8, kernel_size=3, stride)
    in_channels, out_channels, kernel_size = 4, 8, 3
    N, H, W = 2, 16, 16

    key = jax.random.PRNGKey(0)
    kx, kw_key, kb_key = jax.random.split(key, 3)
    x = jax.random.normal(kx, (N, in_channels, H, W), dtype=jnp.float32)
    fan_in = in_channels * kernel_size * kernel_size
    bound = 1.0 / (fan_in ** 0.5)
    weight = jax.random.uniform(
        kw_key, (out_channels, in_channels, kernel_size, kernel_size),
        minval=-bound, maxval=bound, dtype=jnp.float32)
    bias = jax.random.uniform(
        kb_key, (out_channels,), minval=-bound, maxval=bound, dtype=jnp.float32)

    # stride = 1 (ConvLayer(4, 8, 3, 1)); tile_h=8 -> 2 row bands/image (halo exercised)
    out1 = jax.block_until_ready(conv_layer_forward(x, weight, bias, 1, tile_h=8))
    ref1_bf16 = jax.block_until_ready(_reference(x, weight, bias, 1, jnp.bfloat16))
    ref1_f32 = jax.block_until_ready(_reference(x, weight, bias, 1, jnp.float32))
    assert out1.shape == ref1_f32.shape, (out1.shape, ref1_f32.shape)
    assert jnp.allclose(out1, ref1_bf16, rtol=1e-2, atol=1e-2), "stride-1 mismatch (bf16 ref)"
    assert jnp.allclose(out1, ref1_f32, rtol=1e-1, atol=1e-1), "stride-1 mismatch (f32 ref)"

    # stride = 2 (ConvLayer(4, 8, 3, 2)); exercises the space-to-depth path.
    out2 = jax.block_until_ready(conv_layer_forward(x, weight, bias, 2))
    ref2_bf16 = jax.block_until_ready(_reference(x, weight, bias, 2, jnp.bfloat16))
    assert out2.shape == ref2_bf16.shape, (out2.shape, ref2_bf16.shape)
    assert jnp.allclose(out2, ref2_bf16, rtol=1e-2, atol=1e-2), "stride-2 mismatch (bf16 ref)"

    # ragged height (H_out not a multiple of tile_h): exercises pad+slice path.
    x3 = x[:, :, :12, :]
    out3 = jax.block_until_ready(conv_layer_forward(x3, weight, bias, 1, tile_h=8))
    ref3_bf16 = jax.block_until_ready(_reference(x3, weight, bias, 1, jnp.bfloat16))
    assert out3.shape == ref3_bf16.shape, (out3.shape, ref3_bf16.shape)
    assert jnp.allclose(out3, ref3_bf16, rtol=1e-2, atol=1e-2), "ragged-H mismatch (bf16 ref)"

    print("KERNEL_OK")
</pallas_src>

<mosaic_0001>
module attributes {stable_mosaic.version = 11 : i64} {
  func.func @_conv_band_kernel(%arg0: i32, %arg1: i32, %arg2: memref<1x1x4x16x18xbf16, #tpu.memory_space<vmem>>, %arg3: memref<64x192xbf16, #tpu.memory_space<vmem>>, %arg4: memref<64x1xf32, #tpu.memory_space<vmem>>, %arg5: memref<1x8x8x16xf32, #tpu.memory_space<vmem>>) attributes {dimension_semantics = [#tpu.dimension_semantics<parallel>, #tpu.dimension_semantics<parallel>], iteration_bounds = array<i64: 2, 2>, scalar_prefetch = 0 : i64, scratch_operands = 0 : i64, tpu.core_type = #tpu.core_type<tc>, window_params = [{transform_indices = @transform_0, window_bounds = array<i64: 1, 1, 4, 16, 18>}, {pipeline_mode = #tpu.pipeline_mode<synchronous>, transform_indices = @transform_1, window_bounds = array<i64: 64, 192>}, {pipeline_mode = #tpu.pipeline_mode<synchronous>, transform_indices = @transform_2, window_bounds = array<i64: 64, 1>}, {transform_indices = @transform_3, window_bounds = array<i64: 1, 8, 8, 16>}]} {
    %c0 = arith.constant 0 : index
    %c0_0 = arith.constant 0 : index
    %c0_1 = arith.constant 0 : index
    %c0_2 = arith.constant 0 : index
    %c0_3 = arith.constant 0 : index
    %0 = vector.load %arg2[%c0, %c0_0, %c0_1, %c0_2, %c0_3] : memref<1x1x4x16x18xbf16, #tpu.memory_space<vmem>>, vector<1x1x4x16x18xbf16>
    %1 = vector.shape_cast %0 : vector<1x1x4x16x18xbf16> to vector<4x16x18xbf16>
    %2 = vector.extract_strided_slice %1 {offsets = [0, 0, 0], sizes = [4, 16, 16], strides = [1, 1, 1]} : vector<4x16x18xbf16> to vector<4x16x16xbf16>
    %3 = vector.extract_strided_slice %1 {offsets = [0, 0, 1], sizes = [4, 16, 16], strides = [1, 1, 1]} : vector<4x16x18xbf16> to vector<4x16x16xbf16>
    %4 = vector.extract_strided_slice %1 {offsets = [0, 0, 2], sizes = [4, 16, 16], strides = [1, 1, 1]} : vector<4x16x18xbf16> to vector<4x16x16xbf16>
    %5 = tpu.concatenate %2, %3, %4 in 0 : vector<4x16x16xbf16>, vector<4x16x16xbf16>, vector<4x16x16xbf16> -> vector<12x16x16xbf16>
    %6 = vector.shape_cast %5 : vector<12x16x16xbf16> to vector<192x16xbf16>
    %c0_4 = arith.constant 0 : index
    %c0_5 = arith.constant 0 : index
    %7 = vector.load %arg3[%c0_4, %c0_5] : memref<64x192xbf16, #tpu.memory_space<vmem>>, vector<64x192xbf16>
    %cst = arith.constant dense<0.000000e+00> : vector<64x16xf32>
    %8 = tpu.matmul %7, %6, %cst {dimension_numbers = #tpu.dot_dimension_numbers<[1], [0], [0], [1], [0, 0, 1, 1], [], []>} : vector<64x192xbf16>, vector<192x16xbf16>, vector<64x16xf32> -> vector<64x16xf32>
    %c0_6 = arith.constant 0 : index
    %c0_7 = arith.constant 0 : index
    %9 = vector.load %arg4[%c0_6, %c0_7] : memref<64x1xf32, #tpu.memory_space<vmem>>, vector<64x1xf32>
    %10 = vector.broadcast %9 : vector<64x1xf32> to vector<64x16xf32>
    %11 = arith.addf %8, %10 : vector<64x16xf32>
    %12 = vector.shape_cast %11 : vector<64x16xf32> to vector<8x8x16xf32>
    %c0_8 = arith.constant 0 : index
    %c0_9 = arith.constant 0 : index
    %c0_10 = arith.constant 0 : index
    %c0_11 = arith.constant 0 : index
    %13 = vector.load %arg5[%c0_8, %c0_9, %c0_10, %c0_11] : memref<1x8x8x16xf32, #tpu.memory_space<vmem>>, vector<1x8x8x16xf32>
    %14 = vector.shape_cast %13 : vector<1x8x8x16xf32> to vector<8x8x16xf32>
    %15 = vector.shape_cast %12 : vector<8x8x16xf32> to vector<1x8x8x16xf32>
    tpu.vector_store %arg5[%c0_8, %c0_9, %c0_10, %c0_11], %15 {strides = array<i32>} : memref<1x8x8x16xf32, #tpu.memory_space<vmem>>, vector<1x8x8x16xf32>,
    return
  }
  func.func @transform_0(%arg0: i32, %arg1: i32) -> (i32, i32, i32, i32, i32) {
    %c0_i32 = arith.constant 0 : i32
    %c0_i32_0 = arith.constant 0 : i32
    %c0_i32_1 = arith.constant 0 : i32
    %c0_i32_2 = arith.constant 0 : i32
    return %arg0, %arg1, %c0_i32, %c0_i32_0, %c0_i32_1 : i32, i32, i32, i32, i32
  }
  func.func @transform_1(%arg0: i32, %arg1: i32) -> (i32, i32) {
    %c0_i32 = arith.constant 0 : i32
    %c0_i32_0 = arith.constant 0 : i32
    %c0_i32_1 = arith.constant 0 : i32
    return %c0_i32, %c0_i32_0 : i32, i32
  }
  func.func @transform_2(%arg0: i32, %arg1: i32) -> (i32, i32) {
    %c0_i32 = arith.constant 0 : i32
    %c0_i32_0 = arith.constant 0 : i32
    %c0_i32_1 = arith.constant 0 : i32
    return %c0_i32, %c0_i32_0 : i32, i32
  }
  func.func @transform_3(%arg0: i32, %arg1: i32) -> (i32, i32, i32, i32) {
    %c0_i32 = arith.constant 0 : i32
    %c0_i32_0 = arith.constant 0 : i32
    %c0_i32_1 = arith.constant 0 : i32
    return %arg0, %c0_i32, %arg1, %c0_i32_0 : i32, i32, i32, i32
  }
}

</mosaic_0001>

<bundles_post_ra>
// kernel: tpu_custom_call.1
= control target key start
LH: loop header
LB: loop body
LE: loop exit
PB: predicated region body
PF: predicated region fallthrough
CT: control target
= control target key end

     0   :  { %8 = vsyncpa [#allocation3], 0  ;;  %s1191_s0 = inlined_call_operand.hbm [shape: bf16[2,2,4,16,18], index: 0, kind: input, shape index: {}]   ;;  %s1192_s1 = inlined_call_operand.vmem [shape: bf16[64,192], index: 1, kind: input, shape index: {}]   ;;  %s1193_s2 = inlined_call_operand.vmem [shape: f32[64,1], index: 2, kind: input, shape index: {}]   ;;  %s1194_s3 = inlined_call_operand.hbm [shape: f32[2,8,16,16], index: 3, kind: output, shape index: {}]  }
   0x1   :  { %10 = vsyncpa [#allocation3 + $0x1], 0 }
   0x2   :  { %11 = vsyncpa [#allocation4], 0 }
   0x3   :  { %13 = vsyncpa [#allocation4 + $0x1], 0  ;;  %s911_s12 = smov 0   ;;  %s913_s13 = smov 0  }
   0x4   :  { %s915_s14 = smov 0   ;;  %s917_s15 = smov 0  }
   0x5   :  { %s919_s16 = smov 0   ;;  %s921_s17 = smov 0  }
   0x6   :  { %s923_s18 = smov 0   ;;  %s925_s19 = smov 0  }
   0x7 LB: > { %s587_s20 = sadd.s32 4294967295, %s879_s19   ;;  %s588_s21 = sadd.s32 4294967294, %s879_s19   ;;  %s879_s19 = sphi %s925_s19, %s19_s19   ;;  %s875_s18 = sphi %s923_s18, %s1212_s18   ;;  %s871_s17 = sphi %s921_s17, %s1211_s17   ;;  %s867_s16 = sphi %s919_s16, %s1210_s16   ;;  %s863_s15 = sphi %s917_s15, %s1209_s15   ;;  %s859_s14 = sphi %s915_s14, %s1208_s14   ;;  %s855_s13 = sphi %s913_s13, %s1207_s13   ;;  %s851_s12 = sphi %s911_s12, %s1206_s12  }
   0x8   : > { %s28_s22 = sadd.s32 1, %s871_s17  ;;  %s31_s23 = sadd.s32 1, %s875_s18 }
   0x9   : > { %p29_p0 = scmp.ge.s32.totalorder %s28_s22, 2  ;;  %s40_s24 = sadd.s32 1, %s859_s14 }
   0xa   : > { %p47_p1 = scmp.ne.s32.totalorder %s859_s14, %s855_s13  ;;  %p48_p2 = scmp.eq.s32.totalorder %s879_s19, 0 }
   0xb   : > { %s1214_s22 = smov (%p29_p0, %s28_s22), 0  ;;  %s1216_s23 = smov (!%p29_p0, %s31_s23), %s875_s18 }
   0xc   : > { %1197 = sst [smem:[#allocation8_spill]] %s1214_s22  ;;  %s36_s25 = ssub.s32 %s871_s17, %s1214_s22 }
   0xd   : > { %p964_p3 = por %p48_p2, %p47_p1  ;;  %p33_p4 = scmp.ge.s32.totalorder %s1216_s23, 2 }
   0xe   : > { %p53_p5 = scmp.ne.s32.totalorder %s855_s13, %s851_s12  ;;  %p54_p6 = scmp.eq.s32.totalorder %s587_s20, 0 }
   0xf   : > { %p121_p7 = scmp.eq.s32.totalorder %s587_s20, 3  ;;  %s1218_s23 = smov (%p33_p4, %s1216_s23), 0 }
  0x10   : > { %1199 = sst [smem:[#allocation9_spill]] %s1218_s23  ;;  %p972_p8 = por %p54_p6, %p53_p5 }
  0x11   : > { %p976_p9 = por %p121_p7, %p47_p1  ;;  %s35_s29 = ssub.s32 %s875_s18, %s1218_s23 }
  0x12   : > { %p127_p10 = scmp.eq.s32.totalorder %s588_s21, 3  ;;  %s37_s30 = sor.u32 %s36_s25, %s35_s29 }
  0x13   : > { %p38_p11 = scmp.eq.s32.totalorder %s37_s30, 0  ;;  %p663_p13 = scmp.lt.s32.totalorder %s879_s19, 4 }
  0x14   : > { %p982_p12 = por %p127_p10, %p53_p5  ;;  %s153_s5 = sand.u32 1, %s859_s14  }
  0x15   : > { %s989_s6 = scalar_select %p38_p11, %s859_s14, %s40_s24  }
  0x16   : > { %s591_s7 = sshll.u32 %s153_s5, 5  ;;  %s592_s8 = sshll.u32 %s871_s17, 3 }
  0x17   : > { %s593_s9 = sshll.u32 %s875_s18, 4  ;;  %s157_s10 = scalar_lea.vmem [#allocation2], %s591_s7 }
  0x18   : > { %s166_s11 = sshll.u32 %s157_s10, 4  ;;  %s163_s20 = sadd.s32 %s593_s9, %s592_s8  ;;  %s167_s11 = int_to_ptr.vmem [resolvable:$true] %s166_s11 }
  0x19   : > { %s594_s23 = sshll.u32 %s163_s20, 6  ;;  %p995_p0 = pnand %p663_p13, %p964_p3 }
  0x1a   : > { %s165_s30 = scalar_lea.hbm %s1191_s0, %s594_s23  ;;  %s154_s24 = scalar_lea.sflag [#allocation3], %s153_s5 }
  0x1b   : > { %p757_p1 = pneg %p995_p0  ;;  %s768_s22 = scalar_lea.vmem %s167_s11, 512 }
  0x1c   : > { %p769_p2 = scmp.ne.s32.totalorder %s167_s11, %s768_s22  ;;  %s881_s7 = smov [#allocation2]  }
  0x1d   : > { %s773_s8 = sshll.u32 %s881_s7, 4  ;;  %s774_s8 = int_to_ptr.vmem [resolvable:$false] %s773_s8 }
  0x1e   : > { %p771_p4 = pnand %p769_p2, %p757_p1  ;;  %s775_s26 = scalar_lea.vmem %s774_s8, 1024 }
  0x1f   : > { %p776_p3 = scmp.lt.s32.totalorder %s167_s11, %s774_s8  ;;  %p777_p6 = scmp.lt.s32.totalorder %s775_s26, %s768_s22 }
  0x20   : > { %p772_p5 = pneg %p771_p4 }
  0x21   : > { %p778_p7 = por %p777_p6, %p776_p3 }
  0x23   : > { %p779_p10 = pnand %p778_p7, %p772_p5 }
  0x25   : > { %782 = shalt.err (!%p779_p10)
}
  0x26   : > { %s882_s9 = smov 64   ;;  %s883_s23 = smov 4  }
  0x27   : > { %658 = dma.hbm_to_vmem [thread:$0]  (!%p995_p0), %s165_s30, 512, %s167_s11, %s154_s24, %s882_s9, %s882_s9, %s883_s23  }
  0x28   : > { %p595_p11 = scmp.ge.s32.totalorder %s879_s19, 1  ;;  %p174_p13 = scmp.lt.s32.totalorder %s879_s19, 5 }
  0x2a   : > { %p175_p1 = pnand %p595_p11, %p174_p13 }
  0x2b   : > { %s1009_s5 = sand.u32 (!%p175_p1), 1, %s855_s13  }
  0x2c   : > { %178 = sbr.rel (%p175_p1) target bundleno = 443 (0x1bb), region = 32  ;;  %s596_s22 = sshll.u32 (!%p175_p1), %s1009_s5, 5 }
  0x2d   : > { %s181_s10 = scalar_lea.sflag (!%p175_p1), [#allocation3], %s1009_s5  ;;  %s184_s20 = scalar_lea.vmem (!%p175_p1), [#allocation2], %s596_s22 }
  0x31   : > { %842 = dma.done.wait (%p972_p8), %s181_s10, 512  }
  0x32   : > { %844 = vsyncadd (%p972_p8), %s181_s10, 4294966784  ;;  %v884_v0 = vmov 0   ;;  %v214_v1 = vld [vmem:[%s184_s20 + $0x18] sm:$0xf]  ;;  %v212_v2 = vld [vmem:[%s184_s20 + $0x10] sm:$0xf] }
  0x33   : > { %409 = vmatprep.subr.bf16.mxu0 %v884_v0  ;;  %627 = vmatprep.subr.bf16.mxu1 %v884_v0  ;;  %s885_s11 = smov 127   ;;  %v215_v3 = vld [vmem:[%s184_s20 + $0x1c] sm:$0xf]  ;;  %v213_v4 = vld [vmem:[%s184_s20 + $0x14] sm:$0xf]  ;;  %s886_s27 = smov 126  }
  0x34   : > { %738 = vset.pattern.permute.xlu1 %v884_v0  ;;  %737 = vset.pattern.permute.xlu0 %v884_v0  ;;  %v211_v5 = vld [vmem:[%s184_s20 + $0xc] sm:$0xf]  ;;  %v210_v6 = vld [vmem:[%s184_s20 + $0x8] sm:$0xf]  ;;  %v1021_v7 = vcombine.low %v214_v1, %v215_v3  ;;  %v209_v8 = vld [vmem:[%s184_s20 + $0x4] sm:$0xf]  ;;  %v1023_v10 = vcombine.low %v212_v2, %v213_v4 }
  0x35   : > { %236 = vrot.lane.b32.xlu0 %v214_v1, %s885_s11  ;;  %232 = vrot.lane.b32.xlu1 %v212_v2, %s885_s11  ;;  %v208_v9 = vld [vmem:[%s184_s20] sm:$0xf]  ;;  %v1025_v11 = vcombine.low %v210_v6, %v211_v5  ;;  %v745_v13 = vld [vmem:[%s1192_s1 + $0x4] ss:$8 sps:$4 sm:$0xff]   ;;  %vm396_vm0 = vcmask 523264   ;;  %s597_s29 = sshll.u32 %s1009_s5, 6 }
  0x36   : > { %v1027_v12 = vcombine.low %v208_v9, %v209_v8  ;;  %v748_v14 = vld [vmem:[%s1192_s1 + $0x24] ss:$8 sps:$4 sm:$0xff]   ;;  %618 = vmatprep.mubr.msk.bf16.mxu0 %vm396_vm0, %v745_v13  ;;  %v266_v17 = vld [vmem:[%s1193_s2 + $0x10] sm:$0xff]  ;;  %v267_v18 = vld [vmem:[%s1193_s2 + $0x18] sm:$0xff]  ;;  %vm474_vm1 = vcmask 130048   ;;  %s1112_s30 = scalar_lea.vmem [#allocation5], %s597_s29 }
  0x37   : > { %620 = vmatprep.mubr.msk.bf16.mxu1 %vm396_vm0, %v748_v14  ;;  %v265_v15 = vld [vmem:[%s1193_s2 + $0x8] sm:$0xff]  ;;  %v264_v16 = vld [vmem:[%s1193_s2] sm:$0xff]  ;;  %v270_v21 = vld [vmem:[%s1193_s2 + $0x30] sm:$0xff]  ;;  %s623_s24 = sshll.u32 %s867_s16, 4  ;;  %s498_s8 = sshll.u32 %s1112_s30, 4  ;;  %s1125_s8 = int_to_ptr.vmem [resolvable:$true] %s498_s8 }
  0x38   : > { %v268_v19 = vld [vmem:[%s1193_s2 + $0x20] sm:$0xff]  ;;  %v269_v20 = vld [vmem:[%s1193_s2 + $0x28] sm:$0xff]  ;;  %v271_v22 = vld [vmem:[%s1193_s2 + $0x38] sm:$0xff]  ;;  %s495_s7 = sadd.s32 %s863_s15, %s623_s24  ;;  %s484_s23 = scalar_lea.sflag [#allocation4], %s1009_s5 }
  0x39   : > { %238 = vrot.lane.b32.xlu0 %v215_v3, %s885_s11  ;;  %234 = vrot.lane.b32.xlu1 %v213_v4, %s885_s11  ;;  %v743_v47 = vld [vmem:[%s1192_s1] ss:$8 sps:$4 sm:$0xff]   ;;  %v749_v49 = vld [vmem:[%s1192_s1 + $0x14] ss:$8 sps:$4 sm:$0xff]   ;;  %s624_s16 = sshll.u32 %s495_s7, 7  ;;  %s783_s22 = scalar_lea.vmem %s1125_s8, 1024 }
  0x3a   : > { %v746_v48 = vld [vmem:[%s1192_s1 + $0x20] ss:$8 sps:$4 sm:$0xff]   ;;  %v751_v50 = vld [vmem:[%s1192_s1 + $0x34] ss:$8 sps:$4 sm:$0xff]   ;;  %v753_v51 = vld [vmem:[%s1192_s1 + $0x10] ss:$8 sps:$4 sm:$0xff]   ;;  %s1134_s9 = scalar_lea.hbm %s1194_s3, %s624_s16  ;;  %p784_p8 = scmp.ne.s32.totalorder %s1125_s8, %s783_s22 }
  0x3b   : > { %v754_v52 = vld [vmem:[%s1192_s1 + $0x30] ss:$8 sps:$4 sm:$0xff]   ;;  %s887_s10 = smov [#allocation5]  }
  0x3c   : > { %p785_p0 = pnand %p784_p8, %p976_p9  ;;  %s787_s20 = sshll.u32 %s887_s10, 4  ;;  %s788_s20 = int_to_ptr.vmem [resolvable:$false] %s787_s20 }
  0x3d   : > { %230 = vrot.lane.b32.xlu1 %v211_v5, %s885_s11  ;;  %228 = vrot.lane.b32.xlu0 %v210_v6, %s885_s11  ;;  %p790_p4 = scmp.lt.s32.totalorder %s1125_s8, %s788_s20 }
  0x3e   : > { %p786_p2 = pneg %p785_p0 }
  0x41   : > { %226 = vrot.lane.b32.xlu1 %v209_v8, %s885_s11  ;;  %224 = vrot.lane.b32.xlu0 %v208_v9, %s885_s11  ;;  %s789_s11 = scalar_lea.vmem %s788_s20, 2048 }
  0x42   : > { %p791_p5 = scmp.lt.s32.totalorder %s789_s11, %s783_s22 }
  0x44   : > { %p792_p3 = por %p791_p5, %p790_p4 }
  0x45   : > { %254 = vrot.lane.b32.xlu1 %v215_v3, %s886_s27  ;;  %252 = vrot.lane.b32.xlu0 %v214_v1, %s886_s27 }
  0x46   : > { %p793_p6 = pnand %p792_p3, %p786_p2 }
  0x49   : > { %250 = vrot.lane.b32.xlu1 %v213_v4, %s886_s27  ;;  %248 = vrot.lane.b32.xlu0 %v212_v2, %s886_s27 }
  0x4d   : > { %246 = vrot.lane.b32.xlu1 %v211_v5, %s886_s27  ;;  %244 = vrot.lane.b32.xlu0 %v210_v6, %s886_s27 }
  0x51   : > { %242 = vrot.lane.b32.xlu1 %v209_v8, %s886_s27  ;;  %240 = vrot.lane.b32.xlu0 %v208_v9, %s886_s27 }
  0x55   : > { %279 = vperm.xlu1 %738, %v265_v15   ;;  %274 = vperm.xlu0 %737, %v264_v16  }
  0x59   : > { %284 = vperm.xlu1 %738, %v266_v17   ;;  %289 = vperm.xlu0 %737, %v267_v18  }
  0x5d   : > { %294 = vperm.xlu1 %738, %v268_v19   ;;  %299 = vperm.xlu0 %737, %v269_v20  }
  0x61   : > { %304 = vperm.xlu1 %738, %v270_v21   ;;  %309 = vperm.xlu0 %737, %v271_v22  }
  0xa7   : > { %v237_v23 = vpop.permute.xlu0 %236  ;;  %v233_v24 = vpop.permute.xlu1 %232 }
  0xab   : > { %v239_v25 = vpop.permute.xlu0 %238  ;;  %v235_v26 = vpop.permute.xlu1 %234 }
  0xac   : > { %v613_v27 = vcombine.low %v237_v23, %v239_v25  ;;  %v612_v30 = vcombine.low %v233_v24, %v235_v26 }
  0xae   : > { %410 = vmatpush1.bf16.msra.mxu0 %v613_v27  ;;  %639 = vmatpush1.bf16.msra.mxu1 %v613_v27 }
  0xaf   : > { %411 = vmatprep.subr.bf16.mxu0 %v884_v0  ;;  %628 = vmatprep.subr.bf16.mxu1 %v884_v0  ;;  %v231_v28 = vpop.permute.xlu1 %230  ;;  %v229_v29 = vpop.permute.xlu0 %228 }
  0xb0   : > { %v611_v31 = vcombine.low %v229_v29, %v231_v28 }
  0xb2   : > { %412 = vmatpush1.bf16.msra.mxu0 %v612_v30  ;;  %640 = vmatpush1.bf16.msra.mxu1 %v612_v30 }
  0xb3   : > { %413 = vmatprep.subr.bf16.mxu0 %v884_v0  ;;  %629 = vmatprep.subr.bf16.mxu1 %v884_v0  ;;  %v227_v32 = vpop.permute.xlu1 %226  ;;  %v225_v33 = vpop.permute.xlu0 %224 }
  0xb4   : > { %v610_v34 = vcombine.low %v225_v33, %v227_v32 }
  0xb6   : > { %414 = vmatpush1.bf16.msra.mxu0 %v611_v31  ;;  %641 = vmatpush1.bf16.msra.mxu1 %v611_v31 }
  0xb7   : > { %415 = vmatprep.subr.bf16.mxu0 %v884_v0  ;;  %630 = vmatprep.subr.bf16.mxu1 %v884_v0  ;;  %v255_v35 = vpop.permute.xlu1 %254  ;;  %v253_v36 = vpop.permute.xlu0 %252 }
  0xb8   : > { %v617_v39 = vcombine.low %v253_v36, %v255_v35 }
  0xba   : > { %416 = vmatpush1.bf16.msra.mxu0 %v610_v34  ;;  %642 = vmatpush1.bf16.msra.mxu1 %v610_v34 }
  0xbb   : > { %417 = vmatprep.subr.bf16.mxu0 %v884_v0  ;;  %631 = vmatprep.subr.bf16.mxu1 %v884_v0  ;;  %v251_v37 = vpop.permute.xlu1 %250  ;;  %v249_v38 = vpop.permute.xlu0 %248 }
  0xbc   : > { %v616_v42 = vcombine.low %v249_v38, %v251_v37 }
  0xbe   : > { %418 = vmatpush1.bf16.msra.mxu0 %v1021_v7  ;;  %643 = vmatpush1.bf16.msra.mxu1 %v1021_v7 }
  0xbf   : > { %419 = vmatprep.subr.bf16.mxu0 %v884_v0  ;;  %632 = vmatprep.subr.bf16.mxu1 %v884_v0  ;;  %v247_v40 = vpop.permute.xlu1 %246  ;;  %v245_v41 = vpop.permute.xlu0 %244 }
  0xc0   : > { %v615_v43 = vcombine.low %v245_v41, %v247_v40 }
  0xc2   : > { %420 = vmatpush1.bf16.msra.mxu0 %v1023_v10  ;;  %644 = vmatpush1.bf16.msra.mxu1 %v1023_v10 }
  0xc3   : > { %421 = vmatprep.subr.bf16.mxu0 %v884_v0  ;;  %633 = vmatprep.subr.bf16.mxu1 %v884_v0  ;;  %v243_v44 = vpop.permute.xlu1 %242  ;;  %v241_v45 = vpop.permute.xlu0 %240 }
  0xc4   : > { %v614_v46 = vcombine.low %v241_v45, %v243_v44 }
  0xc6   : > { %422 = vmatpush1.bf16.msra.mxu0 %v1025_v11  ;;  %645 = vmatpush1.bf16.msra.mxu1 %v1025_v11 }
  0xc7   : > { %423 = vmatprep.subr.bf16.mxu0 %v884_v0  ;;  %634 = vmatprep.subr.bf16.mxu1 %v884_v0 }
  0xca   : > { %424 = vmatpush1.bf16.msra.mxu0 %v1027_v12  ;;  %646 = vmatpush1.bf16.msra.mxu1 %v1027_v12 }
  0xcb   : > { %433 = vmatprep.subr.bf16.mxu0 %v884_v0  ;;  %635 = vmatprep.subr.bf16.mxu1 %v884_v0 }
  0xce   : > { %434 = vmatpush2.bf16.msra.mxu0 %v617_v39  ;;  %647 = vmatpush2.bf16.msra.mxu1 %v617_v39 }
  0xcf   : > { %435 = vmatprep.subr.bf16.mxu0 %v884_v0  ;;  %636 = vmatprep.subr.bf16.mxu1 %v884_v0 }
  0xd0   : > { %v280_v53 = vpop.permute.xlu1 %279  ;;  %v275_v54 = vpop.permute.xlu0 %274 }
  0xd2   : > { %436 = vmatpush2.bf16.msra.mxu0 %v616_v42  ;;  %648 = vmatpush2.bf16.msra.mxu1 %v616_v42 }
  0xd3   : > { %437 = vmatprep.subr.bf16.mxu0 %v884_v0  ;;  %637 = vmatprep.subr.bf16.mxu1 %v884_v0 }
  0xd4   : > { %v285_v55 = vpop.permute.xlu1 %284  ;;  %v290_v56 = vpop.permute.xlu0 %289 }
  0xd6   : > { %438 = vmatpush2.bf16.msra.mxu0 %v615_v43  ;;  %649 = vmatpush2.bf16.msra.mxu1 %v615_v43 }
  0xd7   : > { %439 = vmatprep.subr.bf16.mxu0 %v884_v0  ;;  %638 = vmatprep.subr.bf16.mxu1 %v884_v0 }
  0xd8   : > { %v295_v57 = vpop.permute.xlu1 %294  ;;  %v300_v0 = vpop.permute.xlu0 %299 }
  0xda   : > { %440 = vmatpush2.bf16.msra.mxu0 %v614_v46  ;;  %650 = vmatpush2.bf16.msra.mxu1 %v614_v46 }
  0xdc   : > { %v305_v7 = vpop.permute.xlu1 %304  ;;  %v310_v14 = vpop.permute.xlu0 %309 }
  0xdd   : > { %442 = vmatmul.mubr.bf16.vlgmr.msra.gmra.mxu0 %v743_v47  ;;  %458 = vmatmul.mubr.bf16.vlgmr.msra.gmra.mxu1 %v746_v48 }
  0xde   : > { %619 = vmatprep.mubr.msk.bf16.mxu0 %vm396_vm0, %v749_v49  ;;  %621 = vmatprep.mubr.msk.bf16.mxu1 %vm396_vm0, %v751_v50 }
  0xe5   : > { %450 = vmatmul.mubr.bf16.gmra.mxu0 %v753_v51  ;;  %466 = vmatmul.mubr.bf16.gmra.mxu1 %v754_v52 }
 0x19d   : > { %v443_v58 = vpop.f32.mrf.mxu0  ;;  %v459_v59 = vpop.f32.mrf.mxu1 }
 0x19e   : > { %v444_v60 = vadd.f32 %v443_v58, %v275_v54  ;;  %v460_v61 = vadd.f32 %v459_v59, %v295_v57 }
 0x19f   : > { %v445_v62 = vpop.f32.mrf.mxu0  ;;  %v461_v63 = vpop.f32.mrf.mxu1 }
 0x1a0   : > { %475 = vst.msk [vmem:[%s1112_s30] sm:$0xff] %vm474_vm1, %v444_v60  ;;  %479 = vst.msk [vmem:[%s1112_s30 + $0x20] sm:$0xff] %vm474_vm1, %v460_v61 }
 0x1a1   : > { %v446_v1 = vpop.f32.mrf.mxu0  ;;  %v462_v2 = vpop.f32.mrf.mxu1 }
 0x1a2   : > { %v447_v3 = vadd.f32 %v446_v1, %v280_v53  ;;  %v463_v4 = vadd.f32 %v462_v2, %v300_v0 }
 0x1a3   : > { %v448_v5 = vpop.f32.mrf.mxu0  ;;  %v464_v6 = vpop.f32.mrf.mxu1 }
 0x1a4   : > { %476 = vst.msk [vmem:[%s1112_s30 + $0x8] sm:$0xff] %vm474_vm1, %v447_v3  ;;  %480 = vst.msk [vmem:[%s1112_s30 + $0x28] sm:$0xff] %vm474_vm1, %v463_v4 }
 0x1a5   : > { %v451_v8 = vpop.f32.mrf.mxu0  ;;  %v467_v9 = vpop.f32.mrf.mxu1 }
 0x1a6   : > { %v452_v10 = vadd.f32 %v451_v8, %v285_v55  ;;  %v468_v11 = vadd.f32 %v467_v9, %v305_v7 }
 0x1a7   : > { %v453_v12 = vpop.f32.mrf.mxu0  ;;  %v469_v13 = vpop.f32.mrf.mxu1 }
 0x1a8   : > { %477 = vst.msk [vmem:[%s1112_s30 + $0x10] sm:$0xff] %vm474_vm1, %v452_v10  ;;  %481 = vst.msk [vmem:[%s1112_s30 + $0x30] sm:$0xff] %vm474_vm1, %v468_v11 }
 0x1a9   : > { %v454_v15 = vpop.f32.mrf.mxu0  ;;  %v470_v16 = vpop.f32.mrf.mxu1 }
 0x1aa   : > { %v455_v17 = vadd.f32 %v454_v15, %v290_v56  ;;  %v471_v18 = vadd.f32 %v470_v16, %v310_v14 }
 0x1ab   : > { %v456_v19 = vpop.f32.mrf.mxu0  ;;  %v472_v20 = vpop.f32.mrf.mxu1 }
 0x1ac   : > { %478 = vst.msk [vmem:[%s1112_s30 + $0x18] sm:$0xff] %vm474_vm1, %v455_v17  ;;  %482 = vst.msk [vmem:[%s1112_s30 + $0x38] sm:$0xff] %vm474_vm1, %v471_v18 }
 0x1ad   : > { %796 = shalt.err (!%p793_p6)
}
 0x1ae   : > { %s797_s27 = scalar_lea.hbm %s1134_s9, 1024  ;;  %s801_s29 = scalar_lea.hbm %s1194_s3, 4096 }
 0x1af   : > { %p798_p7 = scmp.ne.s32.totalorder %s1134_s9, %s797_s27  ;;  %p802_p13 = scmp.lt.s32.totalorder %s1134_s9, %s1194_s3 }
 0x1b0   : > { %p803_p1 = scmp.lt.s32.totalorder %s801_s29, %s797_s27 }
 0x1b1   : > { %p799_p10 = pnand %p798_p7, %p976_p9 }
 0x1b2   : > { %p804_p8 = por %p803_p1, %p802_p13 }
 0x1b3   : > { %p800_p11 = pneg %p799_p10 }
 0x1b5   : > { %p805_p0 = pnand %p804_p8, %p800_p11 }
 0x1b7   : > { %808 = shalt.err (!%p805_p0)
}
 0x1b8   : > { %s888_s7 = smov 128   ;;  %s889_s16 = smov 256  }
 0x1b9   : > { %s890_s15 = smov 8  }
 0x1ba   : > { %653 = dma.vmem_to_hbm [thread:$0]  (%p976_p9), %s1125_s8, 1024, %s1134_s9, %s484_s23, %s888_s7, %s889_s16, %s890_s15  }
 0x1bb PF: > { %p664_p2 = scmp.ge.s32.totalorder %s879_s19, 2  ;;  %s513_s26 = sand.u32 1, %s851_s12  }
 0x1bc   : > { %s514_s22 = scalar_lea.sflag [#allocation4], %s513_s26 }
 0x1bd   : > { %p660_p4 = pnand %p664_p2, %p982_p12 }
 0x1bf   : > { %p661_p5 = pneg %p660_p4 }
 0x1c1   : > { %846 = dma.done.wait (%p661_p5), %s514_s22, 1024  }
 0x1c2   : > { %848 = vsyncadd (%p661_p5), %s514_s22, 4294966272  ;;  %s19_s19 = sadd.s32 1, %s879_s19   ;;  %s1204_s28 = sld [smem:[#allocation8_spill]] }
 0x1c3   : > { %p16_p3 = scmp.ge.s32.totalorder %s19_s19, 6   ;;  %s1205_s5 = sld [smem:[#allocation9_spill]] }
 0x1c4   : > { %s1206_s12 = smov %s855_s13  ;;  %s1207_s13 = smov %s859_s14 }
 0x1c5   : > { %s1208_s14 = smov %s989_s6  ;;  %s1209_s15 = smov %s871_s17 }
 0x1c6   : > { %s1210_s16 = smov %s875_s18  ;;  %18 = sbr.rel (!%p16_p3) target bundleno = 7 (0x7), region = 77 }
 0x1c8   : > { %s1211_s17 = smov %s1204_s28 }
 0x1c9   : > { %s1212_s18 = smov %s1205_s5 }
 0x1cb   :  { %519 = vsyncpa [#allocation3], 1 }
 0x1cc   :  { %521 = vsyncpa [#allocation3 + $0x1], 1 }
 0x1cd   :  { %522 = vsyncpa [#allocation4], 1 }
 0x1ce   :  { %524 = vsyncpa [#allocation4 + $0x1], 1 }

</bundles_post_ra>
